<compile_context>
chip_gen: v5e
topology: v5e:2x2
jax: 0.10.0
libtpu: 0.0.40
codegen_flags: <defaults>
</compile_context>

<pallas_src>
import jax
import jax.numpy as jnp
from jax.experimental import pallas as pl
from jax.experimental.pallas import tpu as pltpu

CLASSIFICATION_WEIGHT = 1.0
TRIPLET_WEIGHT = 1.0
CENTER_WEIGHT = 0.0005
TRIPLET_MARGIN = 0.3

_OUT_LANES = 128  # lane-dense output tiles


def _pick_class_tile(C):
    """Class-axis tile size. Lane dim must be a multiple of 128 or the full dim."""
    if C % 128 != 0:
        return C  # single tile; lane dim equals the full array dim
    max_tc = 512
    try:
        # Bigger tiles on 128 MiB-VMEM generations (v5e/v6e); conservative on
        # the 64 MiB v7x.
        if pltpu.get_tpu_info().vmem_capacity_bytes >= 96 * 1024 * 1024:
            max_tc = 1024
    except Exception:
        pass
    tc = max_tc
    while tc >= 128:
        if C % tc == 0:
            return tc
        tc //= 2
    return C


def _make_ce_kernel(N, TC, KC):
    """Per-head softmax cross entropy with an online (tiled) logsumexp."""

    def kernel(lab_col_ref, logits_ref, out_ref, m_sc, l_sc, corr_sc):
        c = pl.program_id(1)  # class-tile index

        @pl.when(c == 0)
        def _():
            m_sc[...] = jnp.full(m_sc.shape, -jnp.inf, jnp.float32)
            l_sc[...] = jnp.zeros(l_sc.shape, jnp.float32)
            corr_sc[...] = jnp.zeros(corr_sc.shape, jnp.float32)

        logits = logits_ref[...].astype(jnp.float32)          # (N, TC)
        lab = lab_col_ref[...]                                 # (N, 1) int32
        cls_idx = c * TC + jax.lax.broadcasted_iota(jnp.int32, (N, TC), 1)

        m_prev = m_sc[...]
        m_new = jnp.maximum(m_prev, jnp.max(logits, axis=-1, keepdims=True))
        l_sc[...] = (l_sc[...] * jnp.exp(m_prev - m_new)
                     + jnp.sum(jnp.exp(logits - m_new), axis=-1, keepdims=True))
        m_sc[...] = m_new
        # correct-class logit without materializing a one-hot temp
        corr_sc[...] = corr_sc[...] + jnp.sum(
            jnp.where(cls_idx == lab, logits, 0.0), axis=-1, keepdims=True)

        @pl.when(c == KC - 1)
        def _():
            lse = m_sc[...] + jnp.log(l_sc[...])               # (N, 1)
            ce_mean = jnp.sum(lse - corr_sc[...]) * (1.0 / N)
            # single unmasked lane-dense store of this head's mean CE
            out_ref[...] = jnp.full(out_ref.shape, ce_mean, jnp.float32)

    return kernel


def _make_trip_cent_kernel(N, D):
    """Batch-hard triplet loss + center loss (centers gathered by label via DMA)."""

    def kernel(lab_sm_ref, lab_col_ref, lab_row_ref, feats_ref, centers_hbm_ref,
               out_ref, cbuf, sems):
        # Gather centers[labels] row-by-row; the DMAs overlap the triplet math.
        @pl.loop(0, N)
        def _(i):
            pltpu.make_async_copy(
                centers_hbm_ref.at[pl.ds(lab_sm_ref[i], 1)],
                cbuf.at[pl.ds(i, 1)],
                sems.at[i]).start()

        feats = feats_ref[...].astype(jnp.float32)             # (N, D)
        lab_col = lab_col_ref[...]                              # (N, 1)
        lab_row = lab_row_ref[...]                              # (1, N)

        # ---- triplet loss with batch-hard mining on squared distances ----
        sq = jnp.sum(feats * feats, axis=-1, keepdims=True)
        fn = feats * jax.lax.rsqrt(jnp.maximum(sq, 1e-24))      # EUP rsqrt
        # gram[i,j] = fn_i . fn_j  (contract dim 1 with dim 1 -> no transpose)
        gram = jax.lax.dot_general(
            fn, fn, dimension_numbers=(((1,), (1,)), ((), ())),
            preferred_element_type=jnp.float32)                 # (N, N)
        d2 = jnp.maximum(2.0 - 2.0 * gram, 0.0)                 # squared distances

        same = lab_col == lab_row
        r_i = jax.lax.broadcasted_iota(jnp.int32, (N, N), 0)
        c_i = jax.lax.broadcasted_iota(jnp.int32, (N, N), 1)
        mask_pos = jnp.logical_and(same, r_i != c_i)
        mask_neg = jnp.logical_not(same)
        # sqrt is monotonic: mine on d2, sqrt only the two (N,1) hardest vectors
        # (0.0 sentinel for positives since d2 >= 0; +inf for negatives).
        hp2 = jnp.max(jnp.where(mask_pos, d2, 0.0), axis=1, keepdims=True)
        hn2 = jnp.min(jnp.where(mask_neg, d2, jnp.inf), axis=1, keepdims=True)
        trip = jnp.sum(jnp.maximum(
            jnp.sqrt(hp2) - jnp.sqrt(hn2) + TRIPLET_MARGIN, 0.0)) * (1.0 / N)

        # ---- center loss: MSE(features, centers[labels]) on the gathered rows ----
        @pl.loop(0, N)
        def _(i):
            pltpu.make_async_copy(
                centers_hbm_ref.at[pl.ds(0, 1)],
                cbuf.at[pl.ds(i, 1)],
                sems.at[i]).wait()
        diff = feats - cbuf[...].astype(jnp.float32)
        cent = jnp.sum(diff * diff) * (1.0 / (N * D))

        lane = jax.lax.broadcasted_iota(jnp.int32, (1, _OUT_LANES), 1)
        out = jnp.where(lane == 0, trip, 0.0)
        out = jnp.where(lane == 1, cent, out)
        out_ref[...] = out

    return kernel


def fsra_style_loss(predictions, global_features, labels, centers):
    """predictions: list of (N, C) logits (any float dtype); global_features: (N, D);
    labels: (N,) int; centers: (K, D). Returns a dict of JAX scalars (jittable)."""
    P = len(predictions)
    N, C = predictions[0].shape
    D = global_features.shape[1]
    TC = _pick_class_tile(C)
    KC = C // TC

    labels_i32 = labels.astype(jnp.int32)
    labels_col = labels_i32.reshape(N, 1)
    labels_row = labels_i32.reshape(1, N)
    logits = jnp.stack(predictions, axis=0)  # (P, N, C) in HBM, native dtype

    # ---- per-head cross entropy: grid = (heads, class tiles) ----
    ce_out = pl.pallas_call(
        _make_ce_kernel(N, TC, KC),
        out_shape=jax.ShapeDtypeStruct((P, 8, _OUT_LANES), jnp.float32),
        grid=(P, KC),
        in_specs=[
            pl.BlockSpec((N, 1), lambda h, c: (0, 0)),
            # TODO(synk): on 128 MiB-VMEM gens try pipeline_mode=pl.Buffered(3)
            # on this spec to hide the slower v5e HBM pipe.
            pl.BlockSpec((None, N, TC), lambda h, c: (h, 0, c)),
        ],
        out_specs=pl.BlockSpec((1, 8, _OUT_LANES), lambda h, c: (h, 0, 0)),
        scratch_shapes=[pltpu.VMEM((N, 1), jnp.float32)] * 3,
        compiler_params=pltpu.CompilerParams(
            dimension_semantics=("parallel", "arbitrary"),
            vmem_limit_bytes=32 * 1024 * 1024),
    )(labels_col, logits)
    ce_per_head = ce_out[:, 0, 0]  # (P,) per-head CE means

    # ---- triplet + center loss (labels scalar-prefetched for the DMA gather) ----
    tc_out = pl.pallas_call(
        _make_trip_cent_kernel(N, D),
        out_shape=jax.ShapeDtypeStruct((1, _OUT_LANES), jnp.float32),
        grid_spec=pltpu.PrefetchScalarGridSpec(
            num_scalar_prefetch=1,
            grid=(1,),
            in_specs=[
                pl.BlockSpec((N, 1), lambda i, lab: (0, 0)),
                pl.BlockSpec((1, N), lambda i, lab: (0, 0)),
                pl.BlockSpec((N, D), lambda i, lab: (0, 0)),
                pl.BlockSpec(memory_space=pl.ANY),   # centers stay in HBM
            ],
            out_specs=pl.BlockSpec((1, _OUT_LANES), lambda i, lab: (0, 0)),
            scratch_shapes=[
                pltpu.VMEM((N, D), centers.dtype),
                pltpu.SemaphoreType.DMA((N,)),
            ]),
        compiler_params=pltpu.CompilerParams(
            dimension_semantics=("arbitrary",),
            vmem_limit_bytes=32 * 1024 * 1024),
    )(labels_i32, labels_col, labels_row, global_features, centers)

    classification_loss = jnp.mean(ce_per_head)
    triplet_loss = tc_out[0, 0]
    center_loss = tc_out[0, 1]
    total = (CLASSIFICATION_WEIGHT * classification_loss
             + TRIPLET_WEIGHT * triplet_loss
             + CENTER_WEIGHT * center_loss)

    # No host syncs: everything stays on device as JAX scalars.
    losses = {f"classification_loss_{i}": ce_per_head[i] for i in range(P)}
    losses["classification_loss"] = classification_loss
    losses["triplet_loss"] = triplet_loss
    losses["center_loss"] = center_loss
    losses["total"] = total
    return losses


def _reference_losses(predictions, feats, labels, centers):
    """Pure-JAX reference of the PyTorch forward (for correctness check)."""
    logits = jnp.stack(predictions, 0).astype(jnp.float32)
    onehot = jax.nn.one_hot(labels, logits.shape[-1], dtype=jnp.float32)
    lse = jax.scipy.special.logsumexp(logits, axis=-1)
    ce = jnp.mean(lse - jnp.sum(logits * onehot[None], -1), axis=-1)
    cls = jnp.mean(ce)

    f32 = feats.astype(jnp.float32)
    fn = f32 / jnp.maximum(jnp.linalg.norm(f32, axis=1, keepdims=True), 1e-12)
    d2 = jnp.sum((fn[:, None, :] - fn[None, :, :]) ** 2, -1)
    dist = jnp.sqrt(jnp.maximum(d2, 0.0))
    same = labels[:, None] == labels[None, :]
    eye = jnp.eye(labels.shape[0], dtype=bool)
    hp = jnp.max(jnp.where(same & ~eye, dist, -jnp.inf), 1)
    hn = jnp.min(jnp.where(~same, dist, jnp.inf), 1)
    trip = jnp.mean(jnp.maximum(hp - hn + TRIPLET_MARGIN, 0.0))

    cent = jnp.mean((f32 - centers[labels]) ** 2)
    total = (CLASSIFICATION_WEIGHT * cls + TRIPLET_WEIGHT * trip
             + CENTER_WEIGHT * cent)
    return cls, trip, cent, total


if __name__ == "__main__":
    # Small synthetic shapes consistent with the module's forward.
    num_classes = 8     # K (== C for FSRA classification heads)
    N = 8               # batch
    D = 32              # feature dim
    P = 2               # number of prediction heads

    key = jax.random.PRNGKey(0)
    k1, k2, k3, k4 = jax.random.split(key, 4)
    predictions = [jax.random.normal(k1, (N, num_classes), jnp.float32),
                   jax.random.normal(k2, (N, num_classes), jnp.float32)]
    global_features = jax.random.normal(k3, (N, D), jnp.float32)
    labels = jnp.array([0, 0, 1, 1, 2, 2, 3, 3], dtype=jnp.int32)
    # Deterministic init of the CenterLoss parameter (torch.randn equivalent).
    centers = jax.random.normal(k4, (num_classes, D), jnp.float32)

    loss_fn = jax.jit(fsra_style_loss)
    losses = loss_fn(predictions, global_features, labels, centers)
    losses = jax.block_until_ready(losses)   # single device->host boundary (test only)

    # Sanity-check against a pure-JAX reference of the PyTorch semantics.
    ref_cls, ref_trip, ref_cent, ref_total = _reference_losses(
        predictions, global_features, labels, centers)
    assert abs(float(losses["classification_loss"]) - float(ref_cls)) < 1e-4
    assert abs(float(losses["triplet_loss"]) - float(ref_trip)) < 1e-4
    assert abs(float(losses["center_loss"]) - float(ref_cent)) < 1e-4
    assert abs(float(losses["total"]) - float(ref_total)) < 1e-4
    for i in range(P):
        assert f"classification_loss_{i}" in losses

    print("KERNEL_OK")
</pallas_src>

<mosaic_0001>
module attributes {stable_mosaic.version = 11 : i64} {
  func.func @kernel(%arg0: i32, %arg1: i32, %arg2: memref<8x1xi32, #tpu.memory_space<vmem>>, %arg3: memref<1x8x8xf32, #tpu.memory_space<vmem>>, %arg4: memref<1x8x128xf32, #tpu.memory_space<vmem>>, %arg5: memref<8x1xf32, #tpu.memory_space<vmem>>, %arg6: memref<8x1xf32, #tpu.memory_space<vmem>>, %arg7: memref<8x1xf32, #tpu.memory_space<vmem>>) attributes {dimension_semantics = [#tpu.dimension_semantics<parallel>, #tpu.dimension_semantics<arbitrary>], iteration_bounds = array<i64: 2, 1>, scalar_prefetch = 0 : i64, scratch_operands = 3 : i64, tpu.core_type = #tpu.core_type<tc>, window_params = [{pipeline_mode = #tpu.pipeline_mode<synchronous>, transform_indices = @transform_0, window_bounds = array<i64: 8, 1>}, {transform_indices = @transform_1, window_bounds = array<i64: 1, 8, 8>}, {transform_indices = @transform_2, window_bounds = array<i64: 1, 8, 128>}]} {
    %c0_i32 = arith.constant 0 : i32
    %0 = arith.cmpi eq, %arg1, %c0_i32 : i32
    %1 = arith.extui %0 : i1 to i32
    %c0_i32_0 = arith.constant 0 : i32
    %2 = arith.cmpi ne, %1, %c0_i32_0 : i32
    scf.if %2 {
      %cst_22 = arith.constant 0xFF800000 : f32
      %38 = vector.broadcast %cst_22 : f32 to vector<8x1xf32>
      %c0_23 = arith.constant 0 : index
      %c0_24 = arith.constant 0 : index
      %39 = vector.load %arg5[%c0_23, %c0_24] : memref<8x1xf32, #tpu.memory_space<vmem>>, vector<8x1xf32>
      tpu.vector_store %arg5[%c0_23, %c0_24], %38 {strides = array<i32>} : memref<8x1xf32, #tpu.memory_space<vmem>>, vector<8x1xf32>,
      %cst_25 = arith.constant 0.000000e+00 : f32
      %40 = vector.broadcast %cst_25 : f32 to vector<8x1xf32>
      %c0_26 = arith.constant 0 : index
      %c0_27 = arith.constant 0 : index
      %41 = vector.load %arg6[%c0_26, %c0_27] : memref<8x1xf32, #tpu.memory_space<vmem>>, vector<8x1xf32>
      tpu.vector_store %arg6[%c0_26, %c0_27], %40 {strides = array<i32>} : memref<8x1xf32, #tpu.memory_space<vmem>>, vector<8x1xf32>,
      %cst_28 = arith.constant 0.000000e+00 : f32
      %42 = vector.broadcast %cst_28 : f32 to vector<8x1xf32>
      %c0_29 = arith.constant 0 : index
      %c0_30 = arith.constant 0 : index
      %43 = vector.load %arg7[%c0_29, %c0_30] : memref<8x1xf32, #tpu.memory_space<vmem>>, vector<8x1xf32>
      tpu.vector_store %arg7[%c0_29, %c0_30], %42 {strides = array<i32>} : memref<8x1xf32, #tpu.memory_space<vmem>>, vector<8x1xf32>,
    } else {
    }
    %c0 = arith.constant 0 : index
    %c0_1 = arith.constant 0 : index
    %c0_2 = arith.constant 0 : index
    %3 = vector.load %arg3[%c0, %c0_1, %c0_2] : memref<1x8x8xf32, #tpu.memory_space<vmem>>, vector<1x8x8xf32>
    %4 = vector.shape_cast %3 : vector<1x8x8xf32> to vector<8x8xf32>
    %c0_3 = arith.constant 0 : index
    %c0_4 = arith.constant 0 : index
    %5 = vector.load %arg2[%c0_3, %c0_4] : memref<8x1xi32, #tpu.memory_space<vmem>>, vector<8x1xi32>
    %c8_i32 = arith.constant 8 : i32
    %6 = arith.muli %arg1, %c8_i32 : i32
    %7 = tpu.iota {dimensions = array<i32: 1>} : vector<8x8xi32>
    %8 = vector.broadcast %6 : i32 to vector<8x8xi32>
    %9 = arith.addi %8, %7 : vector<8x8xi32>
    %c0_5 = arith.constant 0 : index
    %c0_6 = arith.constant 0 : index
    %10 = vector.load %arg5[%c0_5, %c0_6] : memref<8x1xf32, #tpu.memory_space<vmem>>, vector<8x1xf32>
    %cst = arith.constant dense<0xFF800000> : vector<8xf32>
    %11 = vector.multi_reduction <maximumf>, %4, %cst [1] : vector<8x8xf32> to vector<8xf32>
    %12 = vector.shape_cast %11 : vector<8xf32> to vector<8x1xf32>
    %13 = arith.maximumf %10, %12 : vector<8x1xf32>
    %c0_7 = arith.constant 0 : index
    %c0_8 = arith.constant 0 : index
    %14 = vector.load %arg6[%c0_7, %c0_8] : memref<8x1xf32, #tpu.memory_space<vmem>>, vector<8x1xf32>
    %15 = arith.subf %10, %13 : vector<8x1xf32>
    %16 = math.exp %15 : vector<8x1xf32>
    %17 = arith.mulf %14, %16 : vector<8x1xf32>
    %18 = vector.broadcast %13 : vector<8x1xf32> to vector<8x8xf32>
    %19 = arith.subf %4, %18 : vector<8x8xf32>
    %20 = math.exp %19 : vector<8x8xf32>
    %cst_9 = arith.constant dense<0.000000e+00> : vector<8xf32>
    %21 = vector.multi_reduction <add>, %20, %cst_9 [1] : vector<8x8xf32> to vector<8xf32>
    %22 = vector.shape_cast %21 : vector<8xf32> to vector<8x1xf32>
    %23 = arith.addf %17, %22 : vector<8x1xf32>
    %c0_10 = arith.constant 0 : index
    %c0_11 = arith.constant 0 : index
    %24 = vector.load %arg6[%c0_10, %c0_11] : memref<8x1xf32, #tpu.memory_space<vmem>>, vector<8x1xf32>
    tpu.vector_store %arg6[%c0_10, %c0_11], %23 {strides = array<i32>} : memref<8x1xf32, #tpu.memory_space<vmem>>, vector<8x1xf32>,
    %c0_12 = arith.constant 0 : index
    %c0_13 = arith.constant 0 : index
    %25 = vector.load %arg5[%c0_12, %c0_13] : memref<8x1xf32, #tpu.memory_space<vmem>>, vector<8x1xf32>
    tpu.vector_store %arg5[%c0_12, %c0_13], %13 {strides = array<i32>} : memref<8x1xf32, #tpu.memory_space<vmem>>, vector<8x1xf32>,
    %c0_14 = arith.constant 0 : index
    %c0_15 = arith.constant 0 : index
    %26 = vector.load %arg7[%c0_14, %c0_15] : memref<8x1xf32, #tpu.memory_space<vmem>>, vector<8x1xf32>
    %27 = vector.broadcast %5 : vector<8x1xi32> to vector<8x8xi32>
    %28 = arith.cmpi eq, %9, %27 : vector<8x8xi32>
    %cst_16 = arith.constant 0.000000e+00 : f32
    %29 = vector.broadcast %cst_16 : f32 to vector<8x8xf32>
    %30 = arith.select %28, %4, %29 : vector<8x8xi1>, vector<8x8xf32>
    %cst_17 = arith.constant dense<0.000000e+00> : vector<8xf32>
    %31 = vector.multi_reduction <add>, %30, %cst_17 [1] : vector<8x8xf32> to vector<8xf32>
    %32 = vector.shape_cast %31 : vector<8xf32> to vector<8x1xf32>
    %33 = arith.addf %26, %32 : vector<8x1xf32>
    %c0_18 = arith.constant 0 : index
    %c0_19 = arith.constant 0 : index
    %34 = vector.load %arg7[%c0_18, %c0_19] : memref<8x1xf32, #tpu.memory_space<vmem>>, vector<8x1xf32>
    tpu.vector_store %arg7[%c0_18, %c0_19], %33 {strides = array<i32>} : memref<8x1xf32, #tpu.memory_space<vmem>>, vector<8x1xf32>,
    %c0_i32_20 = arith.constant 0 : i32
    %35 = arith.cmpi eq, %arg1, %c0_i32_20 : i32
    %36 = arith.extui %35 : i1 to i32
    %c0_i32_21 = arith.constant 0 : i32
    %37 = arith.cmpi ne, %36, %c0_i32_21 : i32
    scf.if %37 {
      %c0_22 = arith.constant 0 : index
      %c0_23 = arith.constant 0 : index
      %38 = vector.load %arg5[%c0_22, %c0_23] : memref<8x1xf32, #tpu.memory_space<vmem>>, vector<8x1xf32>
      %c0_24 = arith.constant 0 : index
      %c0_25 = arith.constant 0 : index
      %39 = vector.load %arg6[%c0_24, %c0_25] : memref<8x1xf32, #tpu.memory_space<vmem>>, vector<8x1xf32>
      %40 = math.log %39 : vector<8x1xf32>
      %41 = arith.addf %38, %40 : vector<8x1xf32>
      %c0_26 = arith.constant 0 : index
      %c0_27 = arith.constant 0 : index
      %42 = vector.load %arg7[%c0_26, %c0_27] : memref<8x1xf32, #tpu.memory_space<vmem>>, vector<8x1xf32>
      %43 = arith.subf %41, %42 : vector<8x1xf32>
      %44 = vector.shape_cast %43 : vector<8x1xf32> to vector<1x8x1xf32>
      %cst_28 = arith.constant dense<0.000000e+00> : vector<1xf32>
      %45 = vector.multi_reduction <add>, %44, %cst_28 [1, 2] : vector<1x8x1xf32> to vector<1xf32>
      %46 = vector.shape_cast %45 : vector<1xf32> to vector<1x1x1xf32>
      %47 = vector.extract %46[0, 0, 0] : f32 from vector<1x1x1xf32>
      %cst_29 = arith.constant 1.250000e-01 : f32
      %48 = arith.mulf %47, %cst_29 : f32
      %49 = vector.broadcast %48 : f32 to vector<1x8x128xf32>
      %c0_30 = arith.constant 0 : index
      %c0_31 = arith.constant 0 : index
      %c0_32 = arith.constant 0 : index
      %50 = vector.load %arg4[%c0_30, %c0_31, %c0_32] : memref<1x8x128xf32, #tpu.memory_space<vmem>>, vector<1x8x128xf32>
      tpu.vector_store %arg4[%c0_30, %c0_31, %c0_32], %49 {strides = array<i32>} : memref<1x8x128xf32, #tpu.memory_space<vmem>>, vector<1x8x128xf32>,
    } else {
    }
    return
  }
  func.func @transform_0(%arg0: i32, %arg1: i32) -> (i32, i32) {
    %c0_i32 = arith.constant 0 : i32
    %c0_i32_0 = arith.constant 0 : i32
    %c0_i32_1 = arith.constant 0 : i32
    return %c0_i32, %c0_i32_0 : i32, i32
  }
  func.func @transform_1(%arg0: i32, %arg1: i32) -> (i32, i32, i32) {
    %c0_i32 = arith.constant 0 : i32
    %c0_i32_0 = arith.constant 0 : i32
    return %arg0, %c0_i32, %arg1 : i32, i32, i32
  }
  func.func @transform_2(%arg0: i32, %arg1: i32) -> (i32, i32, i32) {
    %c0_i32 = arith.constant 0 : i32
    %c0_i32_0 = arith.constant 0 : i32
    %c0_i32_1 = arith.constant 0 : i32
    return %arg0, %c0_i32, %c0_i32_0 : i32, i32, i32
  }
}

module attributes {stable_mosaic.version = 11 : i64} {
  func.func @kernel(%arg0: i32, %arg1: memref<8xi32, #tpu.memory_space<smem>>, %arg2: memref<8x1xi32, #tpu.memory_space<vmem>>, %arg3: memref<1x8xi32, #tpu.memory_space<vmem>>, %arg4: memref<8x32xf32, #tpu.memory_space<vmem>>, %arg5: memref<8x32xf32, #tpu.memory_space<any>>, %arg6: memref<1x128xf32, #tpu.memory_space<vmem>>, %arg7: memref<8x32xf32, #tpu.memory_space<vmem>>, %arg8: memref<8x!tpu.dma_semaphore, #tpu.memory_space<semaphore_mem>>) attributes {dimension_semantics = [#tpu.dimension_semantics<arbitrary>], iteration_bounds = array<i64: 1>, scalar_prefetch = 1 : i64, scratch_operands = 2 : i64, tpu.core_type = #tpu.core_type<tc>, window_params = [{pipeline_mode = #tpu.pipeline_mode<synchronous>, transform_indices = @transform_0, window_bounds = array<i64: 8, 1>}, {pipeline_mode = #tpu.pipeline_mode<synchronous>, transform_indices = @transform_1, window_bounds = array<i64: 1, 8>}, {pipeline_mode = #tpu.pipeline_mode<synchronous>, transform_indices = @transform_2, window_bounds = array<i64: 8, 32>}, {}, {pipeline_mode = #tpu.pipeline_mode<synchronous>, transform_indices = @transform_4, window_bounds = array<i64: 1, 128>}]} {
    %c0_i32 = arith.constant 0 : i32
    %c8_i32 = arith.constant 8 : i32
    %0 = arith.addi %c0_i32, %c8_i32 : i32
    %c1_i32 = arith.constant 1 : i32
    scf.for %arg9 = %c0_i32 to %0 step %c1_i32  : i32 {
      %c1_i32_33 = arith.constant 1 : i32
      %67 = arith.muli %arg9, %c1_i32_33 : i32
      %c0_i32_34 = arith.constant 0 : i32
      %68 = arith.addi %c0_i32_34, %67 : i32
      %69 = arith.index_cast %68 : i32 to index
      %70 = memref.load %arg1[%69] : memref<8xi32, #tpu.memory_space<smem>>
      %c0_i32_35 = arith.constant 0 : i32
      %71 = tpu.memref_slice %arg5[%70, %c0_i32_35] : memref<8x32xf32, #tpu.memory_space<any>> -> memref<1x32xf32, #tpu.memory_space<any>>
      %c0_i32_36 = arith.constant 0 : i32
      %72 = tpu.memref_slice %arg7[%68, %c0_i32_36] : memref<8x32xf32, #tpu.memory_space<vmem>> -> memref<1x32xf32, #tpu.memory_space<vmem>>
      %73 = tpu.memref_slice %arg8[%68] : memref<8x!tpu.dma_semaphore, #tpu.memory_space<semaphore_mem>> -> memref<1x!tpu.dma_semaphore, #tpu.memory_space<semaphore_mem>>
      %74 = tpu.memref_squeeze %73 : memref<1x!tpu.dma_semaphore, #tpu.memory_space<semaphore_mem>> -> memref<!tpu.dma_semaphore, #tpu.memory_space<semaphore_mem>>
      tpu.enqueue_dma source(%71 : memref<1x32xf32, #tpu.memory_space<any>>) target(%72 : memref<1x32xf32, #tpu.memory_space<vmem>>) target_semaphore(%74 : memref<!tpu.dma_semaphore, #tpu.memory_space<semaphore_mem>>)
    }
    %c8_i32_0 = arith.constant 8 : i32
    %c0 = arith.constant 0 : index
    %c0_1 = arith.constant 0 : index
    %1 = vector.load %arg4[%c0, %c0_1] : memref<8x32xf32, #tpu.memory_space<vmem>>, vector<8x32xf32>
    %c0_2 = arith.constant 0 : index
    %c0_3 = arith.constant 0 : index
    %2 = vector.load %arg2[%c0_2, %c0_3] : memref<8x1xi32, #tpu.memory_space<vmem>>, vector<8x1xi32>
    %c0_4 = arith.constant 0 : index
    %c0_5 = arith.constant 0 : index
    %3 = vector.load %arg3[%c0_4, %c0_5] : memref<1x8xi32, #tpu.memory_space<vmem>>, vector<1x8xi32>
    %4 = arith.mulf %1, %1 : vector<8x32xf32>
    %cst = arith.constant dense<0.000000e+00> : vector<8xf32>
    %5 = vector.multi_reduction <add>, %4, %cst [1] : vector<8x32xf32> to vector<8xf32>
    %6 = vector.shape_cast %5 : vector<8xf32> to vector<8x1xf32>
    %cst_6 = arith.constant 1.000000e-24 : f32
    %7 = vector.broadcast %cst_6 : f32 to vector<8x1xf32>
    %8 = arith.maximumf %6, %7 : vector<8x1xf32>
    %9 = math.rsqrt %8 : vector<8x1xf32>
    %10 = vector.broadcast %9 : vector<8x1xf32> to vector<8x32xf32>
    %11 = arith.mulf %1, %10 : vector<8x32xf32>
    %cst_7 = arith.constant dense<0.000000e+00> : vector<8x8xf32>
    %12 = tpu.matmul %11, %11, %cst_7 {dimension_numbers = #tpu.dot_dimension_numbers<[1], [1], [0], [0], [0, 0, 1, 0], [], []>} : vector<8x32xf32>, vector<8x32xf32>, vector<8x8xf32> -> vector<8x8xf32>
    %cst_8 = arith.constant 2.000000e+00 : f32
    %13 = vector.broadcast %cst_8 : f32 to vector<8x8xf32>
    %14 = arith.mulf %13, %12 : vector<8x8xf32>
    %cst_9 = arith.constant 2.000000e+00 : f32
    %15 = vector.broadcast %cst_9 : f32 to vector<8x8xf32>
    %16 = arith.subf %15, %14 : vector<8x8xf32>
    %cst_10 = arith.constant 0.000000e+00 : f32
    %17 = vector.broadcast %cst_10 : f32 to vector<8x8xf32>
    %18 = arith.maximumf %16, %17 : vector<8x8xf32>
    %19 = vector.broadcast %2 : vector<8x1xi32> to vector<8x8xi32>
    %20 = vector.broadcast %3 : vector<1x8xi32> to vector<8x8xi32>
    %21 = arith.cmpi eq, %19, %20 : vector<8x8xi32>
    %22 = tpu.iota {dimensions = array<i32: 0>} : vector<8x8xi32>
    %23 = tpu.iota {dimensions = array<i32: 1>} : vector<8x8xi32>
    %24 = arith.cmpi ne, %22, %23 : vector<8x8xi32>
    %25 = arith.andi %21, %24 : vector<8x8xi1>
    %cst_11 = arith.constant dense<true> : vector<8x8xi1>
    %26 = arith.xori %21, %cst_11 : vector<8x8xi1>
    %cst_12 = arith.constant 0.000000e+00 : f32
    %27 = vector.broadcast %cst_12 : f32 to vector<8x8xf32>
    %28 = arith.select %25, %18, %27 : vector<8x8xi1>, vector<8x8xf32>
    %cst_13 = arith.constant dense<0xFF800000> : vector<8xf32>
    %29 = vector.multi_reduction <maximumf>, %28, %cst_13 [1] : vector<8x8xf32> to vector<8xf32>
    %30 = vector.shape_cast %29 : vector<8xf32> to vector<8x1xf32>
    %cst_14 = arith.constant 0x7F800000 : f32
    %31 = vector.broadcast %cst_14 : f32 to vector<8x8xf32>
    %32 = arith.select %26, %18, %31 : vector<8x8xi1>, vector<8x8xf32>
    %cst_15 = arith.constant dense<0x7F800000> : vector<8xf32>
    %33 = vector.multi_reduction <minimumf>, %32, %cst_15 [1] : vector<8x8xf32> to vector<8xf32>
    %34 = vector.shape_cast %33 : vector<8xf32> to vector<8x1xf32>
    %35 = math.sqrt %30 : vector<8x1xf32>
    %36 = math.sqrt %34 : vector<8x1xf32>
    %37 = arith.subf %35, %36 : vector<8x1xf32>
    %cst_16 = arith.constant 3.000000e-01 : f32
    %38 = vector.broadcast %cst_16 : f32 to vector<8x1xf32>
    %39 = arith.addf %37, %38 : vector<8x1xf32>
    %cst_17 = arith.constant 0.000000e+00 : f32
    %40 = vector.broadcast %cst_17 : f32 to vector<8x1xf32>
    %41 = arith.maximumf %39, %40 : vector<8x1xf32>
    %42 = vector.shape_cast %41 : vector<8x1xf32> to vector<1x8x1xf32>
    %cst_18 = arith.constant dense<0.000000e+00> : vector<1xf32>
    %43 = vector.multi_reduction <add>, %42, %cst_18 [1, 2] : vector<1x8x1xf32> to vector<1xf32>
    %44 = vector.shape_cast %43 : vector<1xf32> to vector<1x1x1xf32>
    %45 = vector.extract %44[0, 0, 0] : f32 from vector<1x1x1xf32>
    %cst_19 = arith.constant 1.250000e-01 : f32
    %46 = arith.mulf %45, %cst_19 : f32
    %c0_i32_20 = arith.constant 0 : i32
    %c8_i32_21 = arith.constant 8 : i32
    %47 = arith.addi %c0_i32_20, %c8_i32_21 : i32
    %c1_i32_22 = arith.constant 1 : i32
    scf.for %arg9 = %c0_i32_20 to %47 step %c1_i32_22  : i32 {
      %c1_i32_33 = arith.constant 1 : i32
      %67 = arith.muli %arg9, %c1_i32_33 : i32
      %c0_i32_34 = arith.constant 0 : i32
      %68 = arith.addi %c0_i32_34, %67 : i32
      %c0_i32_35 = arith.constant 0 : i32
      %c0_i32_36 = arith.constant 0 : i32
      %69 = tpu.memref_slice %arg5[%c0_i32_35, %c0_i32_36] : memref<8x32xf32, #tpu.memory_space<any>> -> memref<1x32xf32, #tpu.memory_space<any>>
      %c0_i32_37 = arith.constant 0 : i32
      %70 = tpu.memref_slice %arg7[%68, %c0_i32_37] : memref<8x32xf32, #tpu.memory_space<vmem>> -> memref<1x32xf32, #tpu.memory_space<vmem>>
      %71 = tpu.memref_slice %arg8[%68] : memref<8x!tpu.dma_semaphore, #tpu.memory_space<semaphore_mem>> -> memref<1x!tpu.dma_semaphore, #tpu.memory_space<semaphore_mem>>
      %72 = tpu.memref_squeeze %71 : memref<1x!tpu.dma_semaphore, #tpu.memory_space<semaphore_mem>> -> memref<!tpu.dma_semaphore, #tpu.memory_space<semaphore_mem>>
      tpu.wait_dma2 semaphore(%72 : memref<!tpu.dma_semaphore, #tpu.memory_space<semaphore_mem>>) src(%69 : memref<1x32xf32, #tpu.memory_space<any>>) dst(%70 : memref<1x32xf32, #tpu.memory_space<vmem>>)
    }
    %c8_i32_23 = arith.constant 8 : i32
    %c0_24 = arith.constant 0 : index
    %c0_25 = arith.constant 0 : index
    %48 = vector.load %arg7[%c0_24, %c0_25] : memref<8x32xf32, #tpu.memory_space<vmem>>, vector<8x32xf32>
    %49 = arith.subf %1, %48 : vector<8x32xf32>
    %50 = arith.mulf %49, %49 : vector<8x32xf32>
    %51 = vector.shape_cast %50 : vector<8x32xf32> to vector<1x8x32xf32>
    %cst_26 = arith.constant dense<0.000000e+00> : vector<1xf32>
    %52 = vector.multi_reduction <add>, %51, %cst_26 [1, 2] : vector<1x8x32xf32> to vector<1xf32>
    %53 = vector.shape_cast %52 : vector<1xf32> to vector<1x1x1xf32>
    %54 = vector.extract %53[0, 0, 0] : f32 from vector<1x1x1xf32>
    %cst_27 = arith.constant 3.906250e-03 : f32
    %55 = arith.mulf %54, %cst_27 : f32
    %56 = tpu.iota {dimensions = array<i32: 1>} : vector<1x128xi32>
    %c0_i32_28 = arith.constant 0 : i32
    %57 = vector.broadcast %c0_i32_28 : i32 to vector<1x128xi32>
    %58 = arith.cmpi eq, %56, %57 : vector<1x128xi32>
    %cst_29 = arith.constant 0.000000e+00 : f32
    %59 = vector.broadcast %46 : f32 to vector<1x128xf32>
    %60 = vector.broadcast %cst_29 : f32 to vector<1x128xf32>
    %61 = arith.select %58, %59, %60 : vector<1x128xi1>, vector<1x128xf32>
    %c1_i32_30 = arith.constant 1 : i32
    %62 = vector.broadcast %c1_i32_30 : i32 to vector<1x128xi32>
    %63 = arith.cmpi eq, %56, %62 : vector<1x128xi32>
    %64 = vector.broadcast %55 : f32 to vector<1x128xf32>
    %65 = arith.select %63, %64, %61 : vector<1x128xi1>, vector<1x128xf32>
    %c0_31 = arith.constant 0 : index
    %c0_32 = arith.constant 0 : index
    %66 = vector.load %arg6[%c0_31, %c0_32] : memref<1x128xf32, #tpu.memory_space<vmem>>, vector<1x128xf32>
    tpu.vector_store %arg6[%c0_31, %c0_32], %65 {strides = array<i32>} : memref<1x128xf32, #tpu.memory_space<vmem>>, vector<1x128xf32>,
    return
  }
  func.func @transform_0(%arg0: i32, %arg1: memref<8xi32, #tpu.memory_space<smem>>) -> (i32, i32) {
    %c0_i32 = arith.constant 0 : i32
    %c0_i32_0 = arith.constant 0 : i32
    %c0_i32_1 = arith.constant 0 : i32
    return %c0_i32, %c0_i32_0 : i32, i32
  }
  func.func @transform_1(%arg0: i32, %arg1: memref<8xi32, #tpu.memory_space<smem>>) -> (i32, i32) {
    %c0_i32 = arith.constant 0 : i32
    %c0_i32_0 = arith.constant 0 : i32
    %c0_i32_1 = arith.constant 0 : i32
    return %c0_i32, %c0_i32_0 : i32, i32
  }
  func.func @transform_2(%arg0: i32, %arg1: memref<8xi32, #tpu.memory_space<smem>>) -> (i32, i32) {
    %c0_i32 = arith.constant 0 : i32
    %c0_i32_0 = arith.constant 0 : i32
    %c0_i32_1 = arith.constant 0 : i32
    return %c0_i32, %c0_i32_0 : i32, i32
  }
  func.func @transform_4(%arg0: i32, %arg1: memref<8xi32, #tpu.memory_space<smem>>) -> (i32, i32) {
    %c0_i32 = arith.constant 0 : i32
    %c0_i32_0 = arith.constant 0 : i32
    %c0_i32_1 = arith.constant 0 : i32
    return %c0_i32, %c0_i32_0 : i32, i32
  }
}

</mosaic_0001>

<bundles_post_ra>
// kernel: fsra_style_loss.2
= control target key start
LH: loop header
LB: loop body
LE: loop exit
PB: predicated region body
PF: predicated region fallthrough
CT: control target
= control target key end

     0   :  { %s389_s9 = smov 0   ;;  %s391_s10 = smov 0   ;;  %s442_s0 = inlined_call_operand.vmem [shape: s32[8,1], index: 0, kind: input, shape index: {}]   ;;  %s443_s1 = inlined_call_operand.vmem [shape: f32[2,8,8], index: 1, kind: input, shape index: {}]   ;;  %s444_s2 = inlined_call_operand.vmem [shape: f32[2,8,128], index: 2, kind: output, shape index: {}]  }
   0x1   :  { %s393_s11 = smov 0  }
   0x2 LB: > { %s24_s12 = sadd.s32 1, %s365_s10  ;;  %p305_p0 = scmp.ge.s32.totalorder %s369_s11, 1  ;;  %s369_s11 = sphi %s393_s11, %s12_s11   ;;  %s365_s10 = sphi %s391_s10, %s446_s10   ;;  %s361_s9 = sphi %s389_s9, %s445_s9  }
   0x3   : > { %p26_p1 = scmp.ge.s32.totalorder %s24_s12, 2  ;;  %p128_p2 = scmp.lt.s32.totalorder %s369_s11, 3 }
   0x5   : > { %s448_s12 = smov (%p26_p1, %s24_s12), 0  ;;  %p129_p3 = pnand %p305_p0, %p128_p2 }
   0x6   : > { %p151_p4 = scmp.lt.s32.totalorder (!%p129_p3), %s361_s9, 1 }
   0x7   : > { %132 = sbr.rel (%p129_p3) target bundleno = 584 (0x248), region = 28 }
   0xc   : > { %vm166_vm0 = vcmask 7168   ;;  %v371_v0 = vmov -inf   ;;  %s450_s9 = smov (!%p151_p4, %s361_s9), 1  ;;  %vm178_vm1 = vcmask 64512   ;;  %v372_v3 = vmov 0   ;;  %v171_v5 = vld [vmem:[%s442_s0] sm:$0xff] }
   0xd   : > { %167 = vst.msk [vmem:[#allocation2] sm:$0xff] %vm166_vm0, %v371_v0  ;;  %s306_s13 = sshll.u32 %s450_s9, 3  ;;  %339 = vset.pattern.permute.xlu0 %v372_v3  ;;  %340 = vset.pattern.permute.xlu1 %v372_v3  ;;  %v373_v4 = vmov 0.0   ;;  %v173_v10 = vlaneseq }
   0xe   : > { %s157_s16 = scalar_lea.vmem %s443_s1, %s306_s13  ;;  %168 = vst.msk [vmem:[#allocation3] sm:$0xff] %vm166_vm0, %v373_v4  ;;  %205 = vperm.xlu1 %340, %v171_v5   ;;  %s161_s22 = scalar_lea.vmem %s444_s2, %s306_s13 }
   0xf   : > { %v170_v1 = vld [vmem:[%s157_s16] sm:$0xff]  ;;  %169 = vst.msk [vmem:[#allocation4] sm:$0xff] %vm166_vm0, %v373_v4  ;;  %v174_v12 = vand.u32 127, %v173_v10 }
  0x10   : > { %v179_v2 = vsel %vm178_vm1, %v170_v1, -inf }
  0x11   : > { %180 = vmax.xlane.f32.xlu0 %v179_v2 }
  0x14   : > { %v177_v6 = vld [vmem:[#allocation2] sm:$0xff] }
  0x15   : > { %v183_v25 = vld [vmem:[#allocation3] sm:$0xff] }
  0x16   : > { %v203_v20 = vld [vmem:[#allocation4] sm:$0xff] }
  0x80   : > { %v206_v11 = vpop.permute.xlu1 %205 }
  0x81   : > { %vm207_vm2 = vcmp.eq.s32.totalorder %v174_v12, %v206_v11 }
  0x82   : > { %v208_v13 = vsel %vm207_vm2, %v170_v1, 0.0 }
  0x83   : > { %v209_v14 = vsel %vm178_vm1, %v208_v13, 0.0 }
  0x84   : > { %v181_v7 = vpop.xlane.xlu0 %180  ;;  %210 = vadd.xlane.f32.xlu2 %v209_v14 }
  0x85   : > { %v182_v8 = vmax.f32 %v177_v6, %v181_v7 }
  0x87   : > { %v184_v9 = vsub.f32 %v177_v6, %v182_v8  ;;  %202 = vst.msk [vmem:[#allocation2] sm:$0xff] %vm166_vm0, %v182_v8  ;;  %190 = vperm.xlu0 %339, %v182_v8  }
  0x89   : > { %v185_v23 = vmul.f32 1.442695, %v184_v9 }
  0x8e   : > { %v217_v32 = vld [vmem:[#allocation2] sm:$0xff] }
  0xf7   : > { %v211_v21 = vpop.xlane.xlu2 %210 }
  0xf8   : > { %v212_v22 = vadd.f32 %v211_v21, %v203_v20 }
  0xf9   : > { %v191_v15 = vpop.permute.xlu0 %190 }
  0xfa   : > { %v193_v16 = vsub.f32 %v170_v1, %v191_v15  ;;  %213 = vst.msk [vmem:[#allocation4] sm:$0xff] %vm166_vm0, %v212_v22 }
  0xfc   : > { %v194_v17 = vmul.f32 1.442695, %v193_v16 }
  0xfe   : > { %341 = vpow2.f32 %v194_v17 }
  0xff   : > { %343 = vpow2.f32 %v185_v23 }
 0x101   : > { %v222_v33 = vld [vmem:[#allocation4] sm:$0xff] }
 0x104   : > { %v342_v18 = vpop.eup %341 }
 0x105   : > { %v196_v19 = vsel %vm178_vm1, %v342_v18, 0.0  ;;  %v344_v24 = vpop.eup %343 }
 0x106   : > { %197 = vadd.xlane.f32.xlu1 %v196_v19  ;;  %v187_v26 = vmul.f32 %v344_v24, %v183_v25 }
 0x179   : > { %v198_v27 = vpop.xlane.xlu1 %197 }
 0x17a   : > { %v199_v28 = vadd.f32 %v198_v27, %v187_v26 }
 0x17c   : > { %201 = vst.msk [vmem:[#allocation3] sm:$0xff] %vm166_vm0, %v199_v28 }
 0x183   : > { %v218_v29 = vld [vmem:[#allocation3] sm:$0xff] }
 0x184   : > { %345 = vlog2.f32 %v218_v29 }
 0x18a   : > { %v346_v30 = vpop.eup %345 }
 0x18b   : > { %v220_v31 = vmul.f32 0.6931472, %v346_v30 }
 0x18d   : > { %v221_v34 = vadd.f32 %v220_v31, %v217_v32 }
 0x18f   : > { %v223_v35 = vsub.f32 %v221_v34, %v222_v33 }
 0x191   : > { %v224_v36 = vsel %vm166_vm0, %v223_v35, 0.0 }
 0x192   : > { %225 = vadd.xlane.f32.xlu2 %v224_v36 }
 0x205   : > { %v226_v37 = vpop.xlane.xlu2 %225 }
 0x206   : > { %v227_v38 = vrot.slane %v226_v37, 4 }
 0x208   : > { %v228_v39 = vadd.f32 %v227_v38, %v226_v37 }
 0x20a   : > { %v229_v40 = vrot.slane %v228_v39, 2 }
 0x20c   : > { %v230_v41 = vadd.f32 %v229_v40, %v228_v39 }
 0x20e   : > { %v231_v42 = vrot.slane %v230_v41, 1 }
 0x210   : > { %v232_v43 = vadd.f32 %v231_v42, %v230_v41 }
 0x212   : > { %310 = vpush %v232_v43 }
 0x243   : > { %s311_s19 = spop %310 }
 0x244   : > { %s234_s23 = smul.f32 0.125, %s311_s19 }
 0x246   : > { %v235_v44 = vstv %s234_s23 }
 0x247   : > { %236 = vst [vmem:[%s161_s22] sm:$0xff] %v235_v44 }
 0x248 PF: > { %s12_s11 = sadd.s32 1, %s369_s11   ;;  %s445_s9 = smov %s365_s10 }
 0x249   : > { %p9_p5 = scmp.ge.s32.totalorder %s12_s11, 4   ;;  %s446_s10 = smov %s448_s12 }
 0x24b   :  { %11 = sbr.rel (!%p9_p5) target bundleno = 2 (0x2), region = 66 }

// kernel: fsra_style_loss.3
= control target key start
LH: loop header
LB: loop body
LE: loop exit
PB: predicated region body
PF: predicated region fallthrough
CT: control target
= control target key end

     0   :  { %s355_s21 = smov [#allocation5]   ;;  %s421_s0 = inlined_call_operand.vmem [shape: s32[8], index: 0, kind: input, shape index: {}, may-alias: {0,2}]   ;;  %s422_s1 = inlined_call_operand.vmem [shape: s32[8,1], index: 1, kind: input, shape index: {}]   ;;  %s423_s2 = inlined_call_operand.vmem [shape: s32[1,8], index: 2, kind: input, shape index: {}, may-alias: {0,2}]   ;;  %s424_s3 = inlined_call_operand.vmem [shape: f32[8,32], index: 3, kind: input, shape index: {}]   ;;  %s425_s4 = inlined_call_operand.vmem [shape: f32[8,32], index: 4, kind: input, shape index: {}]   ;;  %s426_s5 = inlined_call_operand.vmem [shape: f32[1,128], index: 5, kind: output, shape index: {}]  }
   0x1   :  { %s11_s20 = sshll.u32 %s421_s0, 4  ;;  %s12_s20 = int_to_ptr.vmem [resolvable:$true] %s11_s20 }
   0x2   :  { %14 = dma.vmem_to_smem %s12_s20, 16, %s355_s21, [#allocation4] }
   0x3   :  { %343 = dma.done.wait [#allocation4], 16 }
   0x4   :  { %344 = vsyncadd [#allocation4], 4294967280 }
   0x5   :  { %17 = sfence }
   0x6   :  { %s347_s22 = smov 0  }
   0x7 LB: > { %s30_s23 = sld [smem:[#allocation5 + %s349_s22]]  ;;  %s32_s27 = scalar_lea.vmem [#allocation2], %s349_s22  ;;  %s349_s22 = sphi %s347_s22, %s29_s22  }
   0x8   : > { %s33_s28 = scalar_lea.sflag [#allocation3], %s349_s22 }
   0xd   : > { %s31_s26 = scalar_lea.vmem %s425_s4, %s30_s23 }
   0xe   : > { %v48_v0 = vld [vmem:[%s31_s26] sm:$0x1] }
   0xf   : > { %49 = vst [vmem:[%s32_s27] sm:$0x1] %v48_v0 }
  0x10   : > { %67 = vsyncadd %s33_s28, 16  ;;  %s29_s22 = sadd.s32 1, %s349_s22  }
  0x11   : > { %p26_p0 = scmp.ge.s32.totalorder %s29_s22, 8  }
  0x12   :  { %v397_v1 = vld [vmem:[%s424_s3] sm:$0xff] (%p26_p0)  ;;  %vm72_vm0 = vcmask (%p26_p0), 261120   ;;  %v356_v5 = vmov (%p26_p0), 0   ;;  %v119_v16 = vlaneseq (%p26_p0)  ;;  %vm127_vm7 = vcmask (%p26_p0), 64512   ;;  %s351_s7 = smov (%p26_p0), 0  }
  0x13   :  { %28 = sbr.rel (!%p26_p0) target bundleno = 7 (0x7), region = 91  ;;  %v71_v2 = vmul.f32 (%p26_p0), %v397_v1, %v397_v1  ;;  %v69_v4 = vld [vmem:[%s422_s1] sm:$0xff] (%p26_p0)  ;;  %315 = vset.pattern.permute.xlu0 (%p26_p0), %v356_v5  ;;  %vm357_vm8 = vmmov (%p26_p0), 1   ;;  %vm162_vm14 = vcmask (%p26_p0), 7168  }
  0x14   :  { %v316_v17 = vld [vmem:[%s423_s2] ss:$0 sm:$0xff] (%p26_p0)  ;;  %v120_v18 = vshrl.u32 (%p26_p0), %v119_v16, 7  ;;  %v411_v19 = vand.u32 (%p26_p0), 127, %v119_v16 }
  0x15   :  { %v73_v3 = vsel (%p26_p0), %vm72_vm0, %v71_v2, 0.0 }
  0x16   :  { %74 = vadd.xlane.f32.xlu0 (%p26_p0), %v73_v3  ;;  %vm123_vm4 = vcmp.ne.s32.totalorder (%p26_p0), %v120_v18, %v411_v19 }
  0x2a   :  { %115 = vperm.xlu0 %315, %v69_v4  }
  0x89   :  { %v75_v6 = vpop.xlane.xlu0 %74 }
  0x8a   :  { %v76_v7 = vmax.f32 %v75_v6, 1e-24 }
  0x8c   :  { %317 = vrsqrt.f32 %v76_v7  ;;  %vm83_vm2 = vweird.f32 %v76_v7 }
  0x92   :  { %v318_v8 = vpop.eup %317 }
  0x93   :  { %v78_v9 = vmul.f32 %v318_v8, %v76_v7  ;;  %vm84_vm1 = vweird.f32 %v318_v8 }
  0x94   :  { %vm85_vm3 = vmor %vm83_vm2, %vm84_vm1 }
  0x95   :  { %v79_v10 = vmul.f32 %v318_v8, %v78_v9 }
  0x97   :  { %v80_v11 = vmul.f32 0.5, %v79_v10 }
  0x99   :  { %v81_v12 = vsub.f32 1.5, %v80_v11 }
  0x9b   :  { %v82_v13 = vmul.f32 %v318_v8, %v81_v12 }
  0x9c   :  { %v116_v20 = vpop.permute.xlu0 %115 }
  0x9d   :  { %v86_v14 = vsel %vm85_vm3, %v318_v8, %v82_v13  ;;  %vm118_vm5 = vcmp.eq.s32.totalorder %v116_v20, %v316_v17 }
  0x9e   :  { %v87_v15 = vmul.f32 %v86_v14, %v397_v1  ;;  %vm124_vm6 = vmand %vm118_vm5, %vm123_vm4 }
  0x9f   :  { %vm125_vm9 = vmxor %vm118_vm5, %vm357_vm8 }
  0xa0   :  { %282 = vmatpush.xpose.msk.msra.mxu0 %vm72_vm0, %v87_v15 }
  0xa3   :  { %283 = vmatmul.msk.f32.vlgmr.msra.gmra.mxu0 %vm72_vm0, %v87_v15 }
 0x120   :  { %v108_v21 = vpop.f32.mrf.mxu0 }
 0x121   :  { %v111_v22 = vmul.f32 2.0, %v108_v21 }
 0x123   :  { %v112_v23 = vsub.f32 2.0, %v111_v22 }
 0x125   :  { %v113_v24 = vmax.f32 %v112_v23, 0.0 }
 0x127   :  { %v126_v25 = vsel %vm124_vm6, %v113_v24, 0.0  ;;  %v131_v27 = vsel %vm125_vm9, %v113_v24, inf }
 0x128   :  { %v128_v26 = vsel %vm127_vm7, %v126_v25, -inf  ;;  %v132_v28 = vsel %vm127_vm7, %v131_v27, inf }
 0x129   :  { %129 = vmax.xlane.f32.xlu1 %v128_v26 }
 0x131   :  { %133 = vmin.xlane.f32.xlu1 %v132_v28 }
 0x19c   :  { %v130_v29 = vpop.xlane.xlu1 %129 }
 0x19d   :  { %319 = vrsqrt.f32 %v130_v29  ;;  %vm142_vm10 = vcmp.eq.f32.partialorder %v130_v29, inf  ;;  %v145_v46 = vand.u32 2147483648, %v130_v29  ;;  %vm144_vm12 = vcmp.eq.f32.partialorder %v130_v29, 0.0 }
 0x1a3   :  { %v320_v30 = vpop.eup %319 }
 0x1a4   :  { %v136_v31 = vmul.f32 %v320_v30, %v130_v29  ;;  %v134_v32 = vpop.xlane.xlu1 %133 }
 0x1a5   :  { %321 = vrsqrt.f32 %v134_v32  ;;  %vm154_vm11 = vcmp.eq.f32.partialorder %v134_v32, inf  ;;  %v157_v47 = vand.u32 2147483648, %v134_v32  ;;  %vm156_vm13 = vcmp.eq.f32.partialorder %v134_v32, 0.0 }
 0x1a6   :  { %v137_v33 = vmul.f32 %v320_v30, %v136_v31 }
 0x1a8   :  { %v138_v34 = vmul.f32 0.5, %v137_v33 }
 0x1aa   :  { %v139_v35 = vsub.f32 1.5, %v138_v34 }
 0x1ab   :  { %v322_v36 = vpop.eup %321 }
 0x1ac   :  { %v148_v37 = vmul.f32 %v322_v36, %v134_v32  ;;  %v140_v39 = vmul.f32 %v320_v30, %v139_v35 }
 0x1ae   :  { %v149_v38 = vmul.f32 %v322_v36, %v148_v37  ;;  %v141_v41 = vmul.f32 %v140_v39, %v130_v29 }
 0x1b0   :  { %v150_v40 = vmul.f32 0.5, %v149_v38  ;;  %v143_v44 = vsel %vm142_vm10, %v130_v29, %v141_v41 }
 0x1b1   :  { %v146_v49 = vsel %vm144_vm12, %v145_v46, %v143_v44 }
 0x1b2   :  { %v151_v42 = vsub.f32 1.5, %v150_v40 }
 0x1b4   :  { %v152_v43 = vmul.f32 %v322_v36, %v151_v42 }
 0x1b6   :  { %v153_v45 = vmul.f32 %v152_v43, %v134_v32 }
 0x1b8   :  { %v155_v48 = vsel %vm154_vm11, %v134_v32, %v153_v45 }
 0x1b9   :  { %v158_v50 = vsel %vm156_vm13, %v157_v47, %v155_v48 }
 0x1ba   :  { %v159_v51 = vsub.f32 %v146_v49, %v158_v50 }
 0x1bc   :  { %v160_v52 = vadd.f32 0.3, %v159_v51 }
 0x1be   :  { %v161_v53 = vmax.f32 %v160_v52, 0.0 }
 0x1c0   :  { %v163_v54 = vsel %vm162_vm14, %v161_v53, 0.0 }
 0x1c1   :  { %164 = vadd.xlane.f32.xlu2 %v163_v54 }
 0x234   :  { %v165_v55 = vpop.xlane.xlu2 %164 }
 0x235   :  { %v166_v56 = vrot.slane %v165_v55, 4 }
 0x237   :  { %v167_v57 = vadd.f32 %v166_v56, %v165_v55 }
 0x239   :  { %v168_v58 = vrot.slane %v167_v57, 2 }
 0x23b   :  { %v169_v59 = vadd.f32 %v168_v58, %v167_v57 }
 0x23d   :  { %v170_v60 = vrot.slane %v169_v59, 1 }
 0x23f   :  { %v171_v61 = vadd.f32 %v170_v60, %v169_v59 }
 0x241   :  { %292 = vpush %v171_v61 }
 0x272   :  { %s293_s2 = spop %292 }
 0x273   :  { %s173_s4 = smul.f32 0.125, %s293_s2 }
 0x274 LB: > { %s180_s8 = scalar_lea.sflag [#allocation3], %s353_s7  ;;  %s353_s7 = sphi %s351_s7, %s179_s7  }
 0x275   : > { %345 = dma.done.wait %s180_s8, 16 }
 0x276   : > { %346 = vsyncadd %s180_s8, 4294967280  ;;  %s179_s7 = sadd.s32 1, %s353_s7  }
 0x277   : > { %p176_p1 = scmp.ge.s32.totalorder %s179_s7, 8  }
 0x278   :  { %v184_v62 = vld [vmem:[#allocation2] sm:$0xff] (%p176_p1)  ;;  %vm198_vm15 = vcmp.eq.s32.totalorder (%p176_p1), %v411_v19, 0  ;;  %v199_v10 = vstv (%p176_p1), %s173_s4  ;;  %vm201_vm1 = vcmp.eq.s32.totalorder (%p176_p1), %v411_v19, 1 }
 0x279   :  { %178 = sbr.rel (!%p176_p1) target bundleno = 628 (0x274), region = 102  ;;  %v185_v63 = vsub.f32 (%p176_p1), %v397_v1, %v184_v62  ;;  %v200_v11 = vsel (%p176_p1), %vm198_vm15, %v199_v10, 0.0 }
 0x27b   :  { %v186_v0 = vmul.f32 (%p176_p1), %v185_v63, %v185_v63 }
 0x27d   :  { %v187_v2 = vsel (%p176_p1), %vm72_vm0, %v186_v0, 0.0 }
 0x27e   :  { %188 = vadd.xlane.f32.xlu0 %v187_v2 }
 0x2f1   :  { %v189_v3 = vpop.xlane.xlu0 %188 }
 0x2f2   :  { %v190_v4 = vrot.slane %v189_v3, 4 }
 0x2f4   :  { %v191_v5 = vadd.f32 %v190_v4, %v189_v3 }
 0x2f6   :  { %v192_v6 = vrot.slane %v191_v5, 2 }
 0x2f8   :  { %v193_v7 = vadd.f32 %v192_v6, %v191_v5 }
 0x2fa   :  { %v194_v8 = vrot.slane %v193_v7, 1 }
 0x2fc   :  { %v195_v9 = vadd.f32 %v194_v8, %v193_v7 }
 0x2fe   :  { %294 = vpush %v195_v9 }
 0x32f   :  { %s295_s9 = spop %294 }
 0x330   :  { %s197_s10 = smul.f32 0.00390625, %s295_s9 }
 0x332   :  { %v202_v1 = vstv %s197_s10 }
 0x333   :  { %v203_v12 = vsel %vm201_vm1, %v202_v1, %v200_v11 }
 0x334   :  { %204 = vst [vmem:[%s426_s5] sm:$0x1] %v203_v12 }
 0x335   :  { %209 = vsyncmov [#allocation3] }
 0x338   :  { %s210_s13 = vpop.sfrf %209 }
 0x339   :  { %p284_p2 = scmp.ne.s32.totalorder %s210_s13, 0 }
 0x33b   :  { %214 = shalt.err (%p284_p2)  }
 0x33c   :  { %216 = vsyncmov [#allocation3 + $0x1] }
 0x33f   :  { %s217_s14 = vpop.sfrf %216 }
 0x340   :  { %p285_p3 = scmp.ne.s32.totalorder %s217_s14, 0 }
 0x342   :  { %221 = shalt.err (%p285_p3)  }
 0x343   :  { %223 = vsyncmov [#allocation3 + $0x2] }
 0x346   :  { %s224_s15 = vpop.sfrf %223 }
 0x347   :  { %p286_p4 = scmp.ne.s32.totalorder %s224_s15, 0 }
 0x349   :  { %228 = shalt.err (%p286_p4)  }
 0x34a   :  { %230 = vsyncmov [#allocation3 + $0x3] }
 0x34d   :  { %s231_s16 = vpop.sfrf %230 }
 0x34e   :  { %p287_p5 = scmp.ne.s32.totalorder %s231_s16, 0 }
 0x350   :  { %235 = shalt.err (%p287_p5)  }
 0x351   :  { %237 = vsyncmov [#allocation3 + $0x4] }
 0x354   :  { %s238_s17 = vpop.sfrf %237 }
 0x355   :  { %p288_p6 = scmp.ne.s32.totalorder %s238_s17, 0 }
 0x357   :  { %242 = shalt.err (%p288_p6)  }
 0x358   :  { %244 = vsyncmov [#allocation3 + $0x5] }
 0x35b   :  { %s245_s5 = vpop.sfrf %244 }
 0x35c   :  { %p289_p7 = scmp.ne.s32.totalorder %s245_s5, 0 }
 0x35e   :  { %249 = shalt.err (%p289_p7)  }
 0x35f   :  { %251 = vsyncmov [#allocation3 + $0x6] }
 0x362   :  { %s252_s18 = vpop.sfrf %251 }
 0x363   :  { %p290_p8 = scmp.ne.s32.totalorder %s252_s18, 0 }
 0x365   :  { %256 = shalt.err (%p290_p8)  }
 0x366   :  { %258 = vsyncmov [#allocation3 + $0x7] }
 0x369   :  { %s259_s19 = vpop.sfrf %258 }
 0x36a   :  { %p291_p9 = scmp.ne.s32.totalorder %s259_s19, 0 }
 0x36c   :  { %263 = shalt.err (%p291_p9)  }

</bundles_post_ra>
